<compile_context>
chip_gen: v5e
topology: v5e:2x2
jax: 0.10.0
libtpu: 0.0.40
codegen_flags: <defaults>
</compile_context>

<pallas_src>
import math
import numpy as np
import jax
import jax.numpy as jnp
from jax import lax
from jax.experimental import pallas as pl
from jax.experimental.pallas import tpu as pltpu


# ------------------------------ helpers ------------------------------------

def _pick_tile(dim, prefs):
    """Largest preferred tile that evenly divides `dim`, else the full dim."""
    for p in prefs:
        if dim % p == 0:
            return p
    return dim


_VMEM_LIMIT = None


def _vmem_limit_bytes():
    """Explicit scoped-VMEM budget (v5e/v6e: 128 MiB physical, v7x: 64 MiB)."""
    global _VMEM_LIMIT
    if _VMEM_LIMIT is None:
        limit = 56 << 20                      # safe on every TPU generation
        try:
            cap = getattr(pltpu.get_tpu_info(), "vmem_capacity_bytes", None)
            if cap:
                limit = min(100 << 20, int(cap) - (8 << 20))
        except Exception:
            pass
        _VMEM_LIMIT = max(int(limit), 32 << 20)
    return _VMEM_LIMIT


# --------------------------- linear projection ------------------------------

def _make_linear_kernel(compute_dtype):
    def kernel(x_ref, w_ref, b_ref, o_ref, acc_ref):
        kk = pl.program_id(2)

        @pl.when(kk == 0)
        def _():
            acc_ref[...] = jnp.zeros(acc_ref.shape, jnp.float32)

        acc_ref[...] += jnp.dot(
            x_ref[...].astype(compute_dtype),
            w_ref[...].astype(compute_dtype),
            preferred_element_type=jnp.float32,
        )

        @pl.when(kk == pl.num_programs(2) - 1)
        def _():
            o_ref[...] = (acc_ref[...] + b_ref[...].astype(jnp.float32)).astype(o_ref.dtype)

    return kernel


def _linear_call(x, w, b, compute_dtype, out_dtype):
    """y = x @ w + b, tiled & pipelined, f32 accumulation, out_dtype output."""
    M, K = x.shape
    N = w.shape[1]
    tm = _pick_tile(M, (1024, 512, 256, 128, 64, 32, 16, 8))
    tn = _pick_tile(N, (256, 128))
    tk = _pick_tile(K, (512, 256, 128))
    b2 = b.reshape(1, N)

    return pl.pallas_call(
        _make_linear_kernel(compute_dtype),
        out_shape=jax.ShapeDtypeStruct((M, N), out_dtype),
        grid=(M // tm, N // tn, K // tk),
        in_specs=[
            pl.BlockSpec((tm, tk), lambda i, j, k: (i, k)),
            pl.BlockSpec((tk, tn), lambda i, j, k: (k, j)),
            pl.BlockSpec((1, tn), lambda i, j, k: (0, j)),
        ],
        out_specs=pl.BlockSpec((tm, tn), lambda i, j, k: (i, j)),
        scratch_shapes=[pltpu.VMEM((tm, tn), jnp.float32)],
        compiler_params=pltpu.CompilerParams(
            dimension_semantics=("parallel", "parallel", "arbitrary"),
            vmem_limit_bytes=_vmem_limit_bytes(),
        ),
    )(x, w, b2)


# ------------------- flash attention (no attention weights) -----------------

def _make_flash_kernel(n_heads, dk, dv, compute_dtype):
    hdk = n_heads * dk

    def kernel(q_ref, kv_ref, o_ref, m_ref, l_ref, acc_ref):
        ki = pl.program_id(2)

        @pl.when(ki == 0)
        def _():
            m_ref[...] = jnp.full(m_ref.shape, -jnp.inf, jnp.float32)
            l_ref[...] = jnp.zeros(l_ref.shape, jnp.float32)
            acc_ref[...] = jnp.zeros(acc_ref.shape, jnp.float32)

        # Static per-head lane slices. The softmax scale is folded into the Q
        # projection weights, so there is no per-score scaling here.
        # TODO(synk): when dk is a multiple of 128, move the head split into a
        #             head grid axis / BlockSpec (strided DMA, less vreg pressure).
        for h in range(n_heads):
            q = q_ref[0, :, h * dk:(h + 1) * dk]                    # (tq, dk)
            k = kv_ref[0, :, h * dk:(h + 1) * dk]                   # (tk, dk)
            v = kv_ref[0, :, hdk + h * dv:hdk + (h + 1) * dv]       # (tk, dv)

            # QK^T as a direct last-dim contraction (no k.T / XLU transpose).
            s = lax.dot_general(q, k, (((1,), (1,)), ((), ())),
                                preferred_element_type=jnp.float32)  # (tq, tk)

            m_prev = m_ref[h]                                        # (tq, 1)
            m_new = jnp.maximum(m_prev, jnp.max(s, axis=-1, keepdims=True))
            alpha = jnp.exp(m_prev - m_new)
            p = jnp.exp(s - m_new)                                   # f32 softmax math

            l_ref[h] = alpha * l_ref[h] + jnp.sum(p, axis=-1, keepdims=True)
            acc_ref[h] = alpha * acc_ref[h] + jnp.dot(
                p.astype(compute_dtype), v, preferred_element_type=jnp.float32)
            m_ref[h] = m_new

        @pl.when(ki == pl.num_programs(2) - 1)
        def _():
            # One lane-dense (tq, H*dv) store instead of H masked sub-128 stores.
            outs = [acc_ref[h] * pl.reciprocal(l_ref[h], approx=True)
                    for h in range(n_heads)]
            o_ref[0] = jnp.concatenate(outs, axis=-1).astype(o_ref.dtype)

    return kernel


def _flash_attention(q, kv, n_heads, dk, dv, compute_dtype):
    """q:(B,L,H*dk), kv:(B,S,H*dk+H*dv) -> out:(B,L,H*dv), all lane-dense."""
    B, L, _ = q.shape
    S = kv.shape[1]
    hdk, hdv = n_heads * dk, n_heads * dv

    tq = _pick_tile(L, (256, 128, 64, 32, 16, 8))
    # Keep at least 2 parallel grid steps so v7x's two TensorCores both get work.
    if B * (L // tq) < 2:
        for cand in (128, 64, 32, 16, 8):
            if L % cand == 0 and B * (L // cand) >= 2:
                tq = cand
                break
    tk = _pick_tile(S, (256, 128, 64, 32, 16, 8))

    return pl.pallas_call(
        _make_flash_kernel(n_heads, dk, dv, compute_dtype),
        out_shape=jax.ShapeDtypeStruct((B, L, hdv), compute_dtype),
        grid=(B, L // tq, S // tk),
        in_specs=[
            pl.BlockSpec((1, tq, hdk), lambda b, qi, ki: (b, qi, 0)),
            pl.BlockSpec((1, tk, hdk + hdv), lambda b, qi, ki: (b, ki, 0)),
        ],
        out_specs=pl.BlockSpec((1, tq, hdv), lambda b, qi, ki: (b, qi, 0)),
        scratch_shapes=[
            pltpu.VMEM((n_heads, tq, 1), jnp.float32),    # running max
            pltpu.VMEM((n_heads, tq, 1), jnp.float32),    # running denom
            pltpu.VMEM((n_heads, tq, dv), jnp.float32),   # output accumulator
        ],
        compiler_params=pltpu.CompilerParams(
            dimension_semantics=("parallel", "parallel", "arbitrary"),
            vmem_limit_bytes=_vmem_limit_bytes(),
        ),
    )(q, kv)


# -------------- attention path that also returns the weights ----------------

def _make_attn_weights_kernel(n_heads, dk, dv, compute_dtype):
    hdk = n_heads * dk

    def kernel(q_ref, kv_ref, o_ref, a_ref):
        outs = []
        for h in range(n_heads):
            q = q_ref[0, :, h * dk:(h + 1) * dk]                    # (tq, dk)
            k = kv_ref[0, :, h * dk:(h + 1) * dk]                   # (S, dk)
            v = kv_ref[0, :, hdk + h * dv:hdk + (h + 1) * dv]       # (S, dv)

            s = lax.dot_general(q, k, (((1,), (1,)), ((), ())),
                                preferred_element_type=jnp.float32)  # (tq, S)
            m = jnp.max(s, axis=-1, keepdims=True)
            p = jnp.exp(s - m)
            # Exact normalization: returned attention rows must sum to 1.
            a = p / jnp.sum(p, axis=-1, keepdims=True)

            outs.append(jnp.dot(a.astype(compute_dtype), v,
                                preferred_element_type=jnp.float32))
            a_ref[0, h] = a.astype(a_ref.dtype)

        # One lane-dense (tq, H*dv) store.
        o_ref[0] = jnp.concatenate(outs, axis=-1).astype(o_ref.dtype)

    return kernel


def _attention_with_weights(q, kv, n_heads, dk, dv, compute_dtype, attn_dtype):
    """Materializes attention weights (tiled over L, full S per block)."""
    B, L, _ = q.shape
    S = kv.shape[1]
    hdk, hdv = n_heads * dk, n_heads * dv
    # Modest tq here: the (tq, S) f32 softmax temporaries live in vregs.
    tq = _pick_tile(L, (128, 64, 32, 16, 8))
    # TODO(synk): for very long S (v7x VMEM budget) this path should be tiled
    #             over S (flash-stats pass + normalize pass); use the flash
    #             path (return_attn=False) when weights are not needed.

    out, attn = pl.pallas_call(
        _make_attn_weights_kernel(n_heads, dk, dv, compute_dtype),
        out_shape=(
            jax.ShapeDtypeStruct((B, L, hdv), compute_dtype),
            jax.ShapeDtypeStruct((B, n_heads, L, S), attn_dtype),
        ),
        grid=(B, L // tq),
        in_specs=[
            pl.BlockSpec((1, tq, hdk), lambda b, qi: (b, qi, 0)),
            pl.BlockSpec((1, S, hdk + hdv), lambda b, qi: (b, 0, 0)),
        ],
        out_specs=(
            pl.BlockSpec((1, tq, hdv), lambda b, qi: (b, qi, 0)),
            pl.BlockSpec((1, n_heads, tq, S), lambda b, qi: (b, 0, qi, 0)),
        ),
        compiler_params=pltpu.CompilerParams(
            dimension_semantics=("parallel", "parallel"),
            vmem_limit_bytes=_vmem_limit_bytes(),
        ),
    )(q, kv)
    return out, attn


# ------------------------ MultiHeadAttentionLayer ---------------------------

def init_params(key, d_model, n_heads, d_keys=None, d_values=None):
    d_keys = d_keys or d_model // n_heads
    d_values = d_values or d_model // n_heads
    ks = jax.random.split(key, 8)

    def lin(kw, kb, fan_in, fan_out):
        bound = 1.0 / math.sqrt(fan_in)
        w = jax.random.uniform(kw, (fan_in, fan_out), jnp.float32, -bound, bound)
        b = jax.random.uniform(kb, (fan_out,), jnp.float32, -bound, bound)
        return w, b

    return {
        "q": lin(ks[0], ks[1], d_model, d_keys * n_heads),
        "k": lin(ks[2], ks[3], d_model, d_keys * n_heads),
        "v": lin(ks[4], ks[5], d_model, d_values * n_heads),
        "o": lin(ks[6], ks[7], d_values * n_heads, d_model),
        "n_heads": n_heads,
        "d_keys": d_keys,
        "d_values": d_values,
    }


def multi_head_attention(params, queries, keys, values, attn_mask=None,
                         return_attn=True, compute_dtype=jnp.bfloat16,
                         attn_dtype=jnp.float32):
    if attn_mask is not None:
        # TODO(synk): causal/padding attention masks are not implemented.
        raise NotImplementedError("attn_mask is not supported (expected None).")

    B, L, d_model = queries.shape
    _, S, _ = keys.shape
    H = params["n_heads"]
    dk = params["d_keys"]
    dv = params["d_values"]
    hdk, hdv = H * dk, H * dv

    # Fold the 1/sqrt(dk) softmax scale into the Q projection (mathematically
    # identical; removes all per-score scaling from the attention kernels).
    scale = 1.0 / math.sqrt(dk)
    wq = params["q"][0] * scale
    bq = params["q"][1] * scale

    # Projections emit compute_dtype (bf16 by default, also on v5e) -> half the
    # HBM traffic into the attention kernels; accumulation/softmax stay f32.
    q = _linear_call(queries.reshape(B * L, d_model), wq, bq,
                     compute_dtype, compute_dtype).reshape(B, L, hdk)

    if keys is values:
        # Fused K|V projection: one kernel launch, one HBM read of the source
        # activations; the fused slab feeds the attention kernels directly.
        wkv = jnp.concatenate([params["k"][0], params["v"][0]], axis=1)
        bkv = jnp.concatenate([params["k"][1], params["v"][1]], axis=0)
        kv = _linear_call(keys.reshape(B * S, d_model), wkv, bkv,
                          compute_dtype, compute_dtype).reshape(B, S, hdk + hdv)
    else:
        k = _linear_call(keys.reshape(B * S, d_model), *params["k"],
                         compute_dtype, compute_dtype).reshape(B, S, hdk)
        v = _linear_call(values.reshape(B * S, d_model), *params["v"],
                         compute_dtype, compute_dtype).reshape(B, S, hdv)
        kv = jnp.concatenate([k, v], axis=-1)

    if return_attn:
        out, attn = _attention_with_weights(q, kv, H, dk, dv, compute_dtype, attn_dtype)
    else:
        out = _flash_attention(q, kv, H, dk, dv, compute_dtype)
        attn = None

    out = _linear_call(out.reshape(B * L, hdv), *params["o"],
                       compute_dtype, queries.dtype).reshape(B, L, d_model)
    return out, attn


# --------------------------- pure-JAX reference ------------------------------

def _reference(params, queries, keys, values):
    B, L, d_model = queries.shape
    S = keys.shape[1]
    H, dk, dv = params["n_heads"], params["d_keys"], params["d_values"]
    q = (queries @ params["q"][0] + params["q"][1]).reshape(B, L, H, dk)
    k = (keys @ params["k"][0] + params["k"][1]).reshape(B, S, H, dk)
    v = (values @ params["v"][0] + params["v"][1]).reshape(B, S, H, dv)
    scale = 1.0 / math.sqrt(dk)
    scores = jnp.einsum("blhe,bshe->bhls", q, k) * scale
    attn = jax.nn.softmax(scores, axis=-1)
    out = jnp.einsum("bhls,bshd->blhd", attn, v).reshape(B, L, H * dv)
    out = out @ params["o"][0] + params["o"][1]
    return out, attn


if __name__ == "__main__":
    key = jax.random.PRNGKey(0)
    k_p, k_x, k_k, k_v = jax.random.split(key, 4)

    B, L, S, d_model, n_heads = 2, 8, 8, 32, 4
    params = init_params(k_p, d_model, n_heads)

    x = jax.random.normal(k_x, (B, L, d_model), jnp.float32)
    keys_x = jax.random.normal(k_k, (B, S, d_model), jnp.float32)
    vals_x = jax.random.normal(k_v, (B, S, d_model), jnp.float32)

    # 1) Self-attention (fused K|V projection), f32 compute, weights returned.
    ref_out, ref_attn = _reference(params, x, x, x)
    out, attn = multi_head_attention(params, x, x, x, attn_mask=None,
                                     return_attn=True, compute_dtype=jnp.float32)
    jax.block_until_ready((out, attn))
    np.testing.assert_allclose(np.asarray(out), np.asarray(ref_out), rtol=5e-3, atol=5e-3)
    np.testing.assert_allclose(np.asarray(attn), np.asarray(ref_attn), rtol=5e-3, atol=5e-3)

    # 2) Self-attention, f32 compute, flash-tiled path (no weights materialized).
    out_fast, _ = multi_head_attention(params, x, x, x, attn_mask=None,
                                       return_attn=False, compute_dtype=jnp.float32)
    jax.block_until_ready(out_fast)
    np.testing.assert_allclose(np.asarray(out_fast), np.asarray(ref_out), rtol=5e-3, atol=5e-3)

    # 3) Cross-attention (distinct keys/values -> unfused K/V path), f32 compute.
    ref_out_x, ref_attn_x = _reference(params, x, keys_x, vals_x)
    out_x, attn_x = multi_head_attention(params, x, keys_x, vals_x, attn_mask=None,
                                         return_attn=True, compute_dtype=jnp.float32)
    jax.block_until_ready((out_x, attn_x))
    np.testing.assert_allclose(np.asarray(out_x), np.asarray(ref_out_x), rtol=5e-3, atol=5e-3)
    np.testing.assert_allclose(np.asarray(attn_x), np.asarray(ref_attn_x), rtol=5e-3, atol=5e-3)

    # 4) bf16 MXU operands / bf16 intermediates (default fast path, all TPU gens).
    out_bf16, _ = multi_head_attention(params, x, x, x, attn_mask=None,
                                       return_attn=False, compute_dtype=jnp.bfloat16)
    jax.block_until_ready(out_bf16)
    np.testing.assert_allclose(np.asarray(out_bf16), np.asarray(ref_out), rtol=5e-2, atol=6e-2)

    print("KERNEL_OK")
</pallas_src>

<mosaic_0001>
module attributes {stable_mosaic.version = 11 : i64} {
  func.func @kernel(%arg0: i32, %arg1: i32, %arg2: i32, %arg3: memref<16x32xf32, #tpu.memory_space<vmem>>, %arg4: memref<32x32xf32, #tpu.memory_space<vmem>>, %arg5: memref<1x32xf32, #tpu.memory_space<vmem>>, %arg6: memref<16x32xf32, #tpu.memory_space<vmem>>, %arg7: memref<16x32xf32, #tpu.memory_space<vmem>>) attributes {dimension_semantics = [#tpu.dimension_semantics<parallel>, #tpu.dimension_semantics<parallel>, #tpu.dimension_semantics<arbitrary>], iteration_bounds = array<i64: 1, 1, 1>, scalar_prefetch = 0 : i64, scratch_operands = 1 : i64, tpu.core_type = #tpu.core_type<tc>, window_params = [{transform_indices = @transform_0, window_bounds = array<i64: 16, 32>}, {transform_indices = @transform_1, window_bounds = array<i64: 32, 32>}, {transform_indices = @transform_2, window_bounds = array<i64: 1, 32>}, {transform_indices = @transform_3, window_bounds = array<i64: 16, 32>}]} {
    %c0_i32 = arith.constant 0 : i32
    %0 = arith.cmpi eq, %arg2, %c0_i32 : i32
    %1 = arith.extui %0 : i1 to i32
    %c0_i32_0 = arith.constant 0 : i32
    %2 = arith.cmpi ne, %1, %c0_i32_0 : i32
    scf.if %2 {
      %cst_10 = arith.constant 0.000000e+00 : f32
      %12 = vector.broadcast %cst_10 : f32 to vector<16x32xf32>
      %c0_11 = arith.constant 0 : index
      %c0_12 = arith.constant 0 : index
      %13 = vector.load %arg7[%c0_11, %c0_12] : memref<16x32xf32, #tpu.memory_space<vmem>>, vector<16x32xf32>
      tpu.vector_store %arg7[%c0_11, %c0_12], %12 {strides = array<i32>} : memref<16x32xf32, #tpu.memory_space<vmem>>, vector<16x32xf32>,
    } else {
    }
    %c0 = arith.constant 0 : index
    %c0_1 = arith.constant 0 : index
    %3 = vector.load %arg7[%c0, %c0_1] : memref<16x32xf32, #tpu.memory_space<vmem>>, vector<16x32xf32>
    %c0_2 = arith.constant 0 : index
    %c0_3 = arith.constant 0 : index
    %4 = vector.load %arg3[%c0_2, %c0_3] : memref<16x32xf32, #tpu.memory_space<vmem>>, vector<16x32xf32>
    %c0_4 = arith.constant 0 : index
    %c0_5 = arith.constant 0 : index
    %5 = vector.load %arg4[%c0_4, %c0_5] : memref<32x32xf32, #tpu.memory_space<vmem>>, vector<32x32xf32>
    %cst = arith.constant dense<0.000000e+00> : vector<16x32xf32>
    %6 = tpu.matmul %4, %5, %cst {dimension_numbers = #tpu.dot_dimension_numbers<[1], [0], [0], [1], [0, 0, 1, 1], [], []>} : vector<16x32xf32>, vector<32x32xf32>, vector<16x32xf32> -> vector<16x32xf32>
    %7 = arith.addf %3, %6 : vector<16x32xf32>
    %c0_6 = arith.constant 0 : index
    %c0_7 = arith.constant 0 : index
    %8 = vector.load %arg7[%c0_6, %c0_7] : memref<16x32xf32, #tpu.memory_space<vmem>>, vector<16x32xf32>
    tpu.vector_store %arg7[%c0_6, %c0_7], %7 {strides = array<i32>} : memref<16x32xf32, #tpu.memory_space<vmem>>, vector<16x32xf32>,
    %c0_i32_8 = arith.constant 0 : i32
    %9 = arith.cmpi eq, %arg2, %c0_i32_8 : i32
    %10 = arith.extui %9 : i1 to i32
    %c0_i32_9 = arith.constant 0 : i32
    %11 = arith.cmpi ne, %10, %c0_i32_9 : i32
    scf.if %11 {
      %c0_10 = arith.constant 0 : index
      %c0_11 = arith.constant 0 : index
      %12 = vector.load %arg7[%c0_10, %c0_11] : memref<16x32xf32, #tpu.memory_space<vmem>>, vector<16x32xf32>
      %c0_12 = arith.constant 0 : index
      %c0_13 = arith.constant 0 : index
      %13 = vector.load %arg5[%c0_12, %c0_13] : memref<1x32xf32, #tpu.memory_space<vmem>>, vector<1x32xf32>
      %14 = vector.broadcast %13 : vector<1x32xf32> to vector<16x32xf32>
      %15 = arith.addf %12, %14 : vector<16x32xf32>
      %c0_14 = arith.constant 0 : index
      %c0_15 = arith.constant 0 : index
      %16 = vector.load %arg6[%c0_14, %c0_15] : memref<16x32xf32, #tpu.memory_space<vmem>>, vector<16x32xf32>
      tpu.vector_store %arg6[%c0_14, %c0_15], %15 {strides = array<i32>} : memref<16x32xf32, #tpu.memory_space<vmem>>, vector<16x32xf32>,
    } else {
    }
    return
  }
  func.func @transform_0(%arg0: i32, %arg1: i32, %arg2: i32) -> (i32, i32) {
    %c0_i32 = arith.constant 0 : i32
    return %arg0, %arg2 : i32, i32
  }
  func.func @transform_1(%arg0: i32, %arg1: i32, %arg2: i32) -> (i32, i32) {
    %c0_i32 = arith.constant 0 : i32
    return %arg2, %arg1 : i32, i32
  }
  func.func @transform_2(%arg0: i32, %arg1: i32, %arg2: i32) -> (i32, i32) {
    %c0_i32 = arith.constant 0 : i32
    %c0_i32_0 = arith.constant 0 : i32
    return %c0_i32, %arg1 : i32, i32
  }
  func.func @transform_3(%arg0: i32, %arg1: i32, %arg2: i32) -> (i32, i32) {
    %c0_i32 = arith.constant 0 : i32
    return %arg0, %arg1 : i32, i32
  }
}

</mosaic_0001>

<bundles_post_ra>
// kernel: tpu_custom_call.1
= control target key start
LH: loop header
LB: loop body
LE: loop exit
PB: predicated region body
PF: predicated region fallthrough
CT: control target
= control target key end

     0   :  { %8 = vsyncpa [#allocation4], 0  ;;  %s275_s0 = inlined_call_operand.hbm [shape: f32[16,32], index: 0, kind: input, shape index: {}]   ;;  %s276_s1 = inlined_call_operand.hbm [shape: f32[32,32], index: 1, kind: input, shape index: {}]   ;;  %s277_s2 = inlined_call_operand.vmem [shape: f32[1,32], index: 2, kind: input, shape index: {}]   ;;  %s278_s3 = inlined_call_operand.hbm [shape: f32[16,32], index: 3, kind: output, shape index: {}]  }
   0x1   :  { %9 = vsyncpa [#allocation7], 0 }
   0x2   :  { %10 = vsyncpa [#allocation5], 0  ;;  %s15_s14 = sshll.u32 %s275_s0, 4  ;;  %s220_s15 = smov [#allocation3]   ;;  %s16_s14 = int_to_ptr.hbm [resolvable:$true] %s15_s14 }
   0x3   :  { %s17_s16 = sshll.u32 %s220_s15, 4  ;;  %s28_s19 = sshll.u32 %s276_s1, 4  ;;  %s18_s16 = int_to_ptr.vmem [resolvable:$true] %s17_s16  ;;  %s29_s19 = int_to_ptr.hbm [resolvable:$true] %s28_s19 }
   0x4   :  { %s221_s20 = smov 128   ;;  %s222_s21 = smov 8  }
   0x5   :  { %23 = dma.hbm_to_vmem [thread:$0]  %s16_s14, 256, %s18_s16, [#allocation4], %s221_s20, %s221_s20, %s222_s21  }
   0x6   :  { %s223_s22 = smov [#allocation6]  }
   0x7   :  { %s30_s23 = sshll.u32 %s223_s22, 4  ;;  %s31_s23 = int_to_ptr.vmem [resolvable:$true] %s30_s23 }
   0x8   :  { %36 = dma.hbm_to_vmem [thread:$0]  %s29_s19, 512, %s31_s23, [#allocation7], %s221_s20, %s221_s20, %s222_s21  }
   0x9   :  { %214 = dma.done.wait [#allocation4], 256  }
   0xa   :  { %215 = vsyncadd [#allocation4], 4294967040 }
   0xb   :  { %216 = dma.done.wait [#allocation7], 512  }
   0xc   :  { %217 = vsyncadd [#allocation7], 4294966784  ;;  %vm51_vm0 = vcmask 261120   ;;  %v224_v0 = vmov 0.0   ;;  %v61_v1 = vld [vmem:[#allocation6 + $0x18] sm:$0xff]  ;;  %v60_v2 = vld [vmem:[#allocation6 + $0x10] sm:$0xff] }
   0xd   :  { %52 = vst.msk [vmem:[#allocation2] sm:$0xff] %vm51_vm0, %v224_v0  ;;  %81 = vmatpush.msra.mxu0 %v61_v1  ;;  %131 = vmatpush.msra.mxu1 %v61_v1  ;;  %v59_v3 = vld [vmem:[#allocation6 + $0x8] sm:$0xff]  ;;  %v58_v4 = vld [vmem:[#allocation6] sm:$0xff]  ;;  %v56_v5 = vld [vmem:[#allocation3] sm:$0xff]  ;;  %s225_s24 = smov [#allocation8]   ;;  %s115_s28 = sshll.u32 %s278_s3, 4  ;;  %s116_s28 = int_to_ptr.hbm [resolvable:$true] %s115_s28 }
   0xe   :  { %53 = vst.msk [vmem:[#allocation2 + $0x8] sm:$0xff] %vm51_vm0, %v224_v0  ;;  %v57_v6 = vld [vmem:[#allocation3 + $0x8] sm:$0xff]  ;;  %v141_v13 = vld [vmem:[%s277_s2] ss:$0 sm:$0xff]  ;;  %s113_s25 = sshll.u32 %s225_s24, 4  ;;  %s114_s25 = int_to_ptr.vmem [resolvable:$true] %s113_s25 }
   0xf   :  { %82 = vmatpush.msra.mxu0 %v60_v2  ;;  %132 = vmatpush.msra.mxu1 %v60_v2 }
  0x11   :  { %83 = vmatpush.msra.mxu0 %v59_v3  ;;  %133 = vmatpush.msra.mxu1 %v59_v3 }
  0x13   :  { %84 = vmatpush.msra.mxu0 %v58_v4  ;;  %134 = vmatpush.msra.mxu1 %v58_v4 }
  0x14   :  { %129 = vmatmul.msk.f32.vlgmr.msra.gmra.mxu0 %vm51_vm0, %v56_v5  ;;  %130 = vmatmul.msk.f32.vlgmr.msra.gmra.mxu1 %vm51_vm0, %v57_v6  ;;  %v54_v7 = vld [vmem:[#allocation2] sm:$0xff] }
  0x15   :  { %v55_v8 = vld [vmem:[#allocation2 + $0x8] sm:$0xff] }
  0x91   :  { %v86_v9 = vpop.f32.mrf.mxu0  ;;  %v89_v10 = vpop.f32.mrf.mxu1 }
  0x92   :  { %v92_v11 = vadd.f32 %v86_v9, %v54_v7  ;;  %v93_v12 = vadd.f32 %v89_v10, %v55_v8 }
  0x94   :  { %94 = vst.msk [vmem:[#allocation2] sm:$0xff] %vm51_vm0, %v92_v11 }
  0x95   :  { %95 = vst.msk [vmem:[#allocation2 + $0x8] sm:$0xff] %vm51_vm0, %v93_v12 }
  0x9b   :  { %v99_v14 = vld [vmem:[#allocation2] sm:$0xff] }
  0x9c   :  { %v100_v15 = vld [vmem:[#allocation2 + $0x8] sm:$0xff]  ;;  %v105_v16 = vadd.f32 %v141_v13, %v99_v14 }
  0x9d   :  { %v106_v17 = vadd.f32 %v141_v13, %v100_v15 }
  0x9e   :  { %107 = vst.msk [vmem:[#allocation8] sm:$0xff] %vm51_vm0, %v105_v16 }
  0x9f   :  { %108 = vst.msk [vmem:[#allocation8 + $0x8] sm:$0xff] %vm51_vm0, %v106_v17 }
  0xa0   :  { %121 = dma.vmem_to_hbm [thread:$0]  %s114_s25, 256, %s116_s28, [#allocation5], %s221_s20, %s221_s20, %s222_s21  }
  0xa1   :  { %218 = dma.done.wait [#allocation5], 256  }
  0xa2   :  { %219 = vsyncadd [#allocation5], 4294967040 }
  0xa3   :  { %126 = vsyncpa [#allocation4], 1 }
  0xa4   :  { %127 = vsyncpa [#allocation7], 1 }
  0xa5   :  { %128 = vsyncpa [#allocation5], 1 }

</bundles_post_ra>
